<compile_context>
chip_gen: v7x
topology: tpu7x:2x2x1
jax: 0.10.0
libtpu: 0.0.40
codegen_flags: <defaults>
</compile_context>

<pallas_src>
import functools
import math

import jax
import jax.numpy as jnp
from jax.experimental import pallas as pl
from jax.experimental.pallas import tpu as pltpu


def _dequantizer_kernel(*refs, shifts, has_features, ef_rows_total):
    """One grid step processes Bt images.

    Layout: activations are (Bt*C, H*W) — rows are (image, channel) planes,
    lanes are the flattened spatial axis.  Channel mixing uses block-diagonal
    weights (built in the wrapper), so garbage rows of a partial block can
    never contaminate valid rows.

    Ref order:
      has_features: ef(Bt*D,N) lat(Bt*C,N) w0(Bt*C,Bt*D) b0(Bt*C,1)
                    wtaps(18,Bt*C,Bt*C) b1(Bt*C,1) b2(Bt*C,1)
                    masks(9,Bt*C,N) | out(Bt*C,N)
      else:         lat z0(Bt*C,1) wtaps b1 b2 masks | out
    """
    if has_features:
        (ef_ref, lat_ref, w0_ref, b0_ref, wt_ref, b1_ref, b2_ref,
         m_ref, out_ref) = refs
    else:
        (lat_ref, z0_ref, wt_ref, b1_ref, b2_ref, m_ref, out_ref) = refs

    f32 = jnp.float32
    R, N = lat_ref.shape

    def lrelu(x):
        # LeakyReLU(0.01) == max(x, 0.01*x) for slope < 1 (cheaper than where).
        return jnp.maximum(x, 0.01 * x)

    # ---- 1x1 conv (d_model -> C) + LeakyReLU, block-diagonal over images ----
    if has_features:
        ef = ef_ref[...].astype(f32)
        if ef_rows_total is not None:
            # Partial trailing grid block: zero the stale (padded) rows so the
            # structural zeros of the block-diagonal weight can't yield 0*NaN.
            rows = jax.lax.broadcasted_iota(jnp.int32, ef.shape, 0)
            valid = ef_rows_total - pl.program_id(0) * ef.shape[0]
            ef = jnp.where(rows < valid, ef, 0.0)
        z = lrelu(jnp.dot(w0_ref[...], ef, preferred_element_type=f32)
                  + b0_ref[...])
    else:
        # entropy_features == 0: the conv collapses to lrelu(bias), which was
        # precomputed in the wrapper (no zero-fill, no add, no lrelu here).
        # TODO(synk): z is spatially constant in this branch; the first 3x3
        # conv could be short-circuited further (interior is a per-channel
        # constant), but the generic path below is kept for simplicity.
        z = jnp.broadcast_to(z0_ref[...], (R, N))

    # ---- 3x3 "same" conv, slab-free: 9 lane-rolled + border-masked taps,
    # each consumed by one block-diagonal MXU matmul and accumulated. --------
    def conv3x3(x, wbase, b_ref):
        acc = None
        for k, shift in enumerate(shifts):
            t = pltpu.roll(x, shift=shift, axis=1) if shift else x
            if k != 4:                       # centre tap needs no border mask
                t = t * m_ref[k]             # masks pre-broadcast to (R, N)
            p = jnp.dot(wt_ref[wbase + k], t, preferred_element_type=f32)
            acc = p if acc is None else acc + p
        return acc + b_ref[...]

    # ResidualBlock: conv -> lrelu -> conv -> lrelu -> + skip (z)
    r = lrelu(conv3x3(z, 0, b1_ref))
    r = lrelu(conv3x3(r, 9, b2_ref))

    out_ref[...] = (lat_ref[...].astype(f32) + r + z).astype(out_ref.dtype)


def _choose_images_per_block(B, C):
    """Images per grid step.

    Constraints / preferences (perf review):
      * Bt*C <= 128 so the block-diagonal weights fit one MXU contraction tile
        (keeps the MXU padding/zero waste bounded).
      * Bt*C a multiple of 8 (full sublane tiles, unmasked stores) unless the
        block covers all of B.
      * >= 2 grid steps when B allows it (v7x dual TensorCores).
      * Prefer a Bt that divides B (no partial trailing block) if one exists
        close to the size cap.
    """
    cap = max(1, 128 // max(C, 1))
    g = 8 // math.gcd(C, 8)

    def ok(bt):
        return bt == B or bt % g == 0

    cands = [bt for bt in range(1, min(B, cap) + 1) if ok(bt)]
    if not cands:
        return B
    half = [bt for bt in cands if bt <= -(-B // 2)] or cands
    bt = max(half)
    near_div = [d for d in half if B % d == 0 and 4 * d >= 3 * bt]
    if near_div:
        bt = max(near_div)
    return bt


def dequantize(latent_q, entropy_features, params):
    """latent_q: (B, C, H, W); entropy_features: (B, d_model, H, W) or None.

    params use PyTorch-native layouts:
      w0 (C, D, 1, 1), b0 (C,), w1 (C, C, 3, 3), b1 (C,), w2 (C, C, 3, 3), b2 (C,)
    Returns (B, C, H, W).
    """
    B, C, H, W = latent_q.shape
    N = H * W
    w0, b0, w1, b1, w2, b2 = params
    D = w0.shape[1]
    has_features = entropy_features is not None
    f32 = jnp.float32

    Bt = _choose_images_per_block(B, C)
    R = Bt * C
    grid = (pl.cdiv(B, Bt),)
    partial = (B % Bt) != 0

    # ---- weight repacking (once, in the wrapper; tiny) ----------------------
    eye = jnp.eye(Bt, dtype=f32)

    def bdiag(w2d):                      # (o, i) -> block-diagonal (Bt*o, Bt*i)
        return jnp.kron(eye, w2d.astype(f32))

    # tap enumeration shared by shifts, masks and per-tap weights
    offs = [(dy, dx) for dy in (-1, 0, 1) for dx in (-1, 0, 1)]
    # roll so that t[n] = x[n + dy*W + dx]  (masked at image borders below)
    shifts = tuple((-(dy * W + dx)) % N for dy, dx in offs)

    wtaps = jnp.stack(
        [bdiag(w1[:, :, dy + 1, dx + 1]) for dy, dx in offs]
        + [bdiag(w2[:, :, dy + 1, dx + 1]) for dy, dx in offs])   # (18, R, R)
    b1t = jnp.tile(b1.astype(f32), Bt).reshape(R, 1)
    b2t = jnp.tile(b2.astype(f32), Bt).reshape(R, 1)

    # ---- border-validity masks, precomputed once, resident in VMEM ----------
    pos = jnp.arange(N)
    rowi, coli = pos // W, pos % W
    m_list = []
    for dy, dx in offs:
        m = jnp.ones((N,), bool)
        if dy == -1:
            m = m & (rowi >= 1)
        if dy == 1:
            m = m & (rowi <= H - 2)
        if dx == -1:
            m = m & (coli >= 1)
        if dx == 1:
            m = m & (coli <= W - 2)
        m_list.append(m)
    masks = jnp.broadcast_to(
        jnp.stack(m_list).astype(f32)[:, None, :], (9, R, N))     # (9, R, N)

    # ---- activations: pure reshapes, no HBM transpose ------------------------
    lat2 = latent_q.reshape(B * C, N)

    lat_spec = pl.BlockSpec((R, N), lambda g: (g, 0))
    out_spec = pl.BlockSpec((R, N), lambda g: (g, 0))

    def rep(shape):                      # resident inputs, fetched once
        if len(shape) == 2:
            return pl.BlockSpec(shape, lambda g: (0, 0))
        return pl.BlockSpec(shape, lambda g: (0, 0, 0))

    if has_features:
        ef2 = entropy_features.reshape(B * D, N)
        w0bd = bdiag(w0.reshape(C, D))                            # (R, Bt*D)
        b0t = jnp.tile(b0.astype(f32), Bt).reshape(R, 1)
        inputs = (ef2, lat2, w0bd, b0t, wtaps, b1t, b2t, masks)
        in_specs = [pl.BlockSpec((Bt * D, N), lambda g: (g, 0)), lat_spec,
                    rep((R, Bt * D)), rep((R, 1)), rep((18, R, R)),
                    rep((R, 1)), rep((R, 1)), rep((9, R, N))]
        lat_idx = 1
    else:
        z0t = jnp.tile(jnp.maximum(b0, 0.01 * b0).astype(f32), Bt).reshape(R, 1)
        inputs = (lat2, z0t, wtaps, b1t, b2t, masks)
        in_specs = [lat_spec, rep((R, 1)), rep((18, R, R)),
                    rep((R, 1)), rep((R, 1)), rep((9, R, N))]
        lat_idx = 0

    kernel = functools.partial(
        _dequantizer_kernel, shifts=shifts, has_features=has_features,
        ef_rows_total=(B * D) if (partial and has_features) else None)

    # ---- VMEM budget computed from the actual block sizes --------------------
    itm = 4
    stream = (2 * R * N + (Bt * D * N if has_features else 0)) * itm
    resident = (18 * R * R + (R * Bt * D if has_features else 0)
                + 9 * R * N + 4 * R) * itm
    temps = 6 * R * N * itm              # z, r, per-tap temp, accumulators
    need = 2 * stream + resident + temps  # 2x: double-buffered streamed blocks
    vmem_bytes = int(min(max(need + (8 << 20), 16 << 20), 64 << 20))

    out2 = pl.pallas_call(
        kernel,
        out_shape=jax.ShapeDtypeStruct((B * C, N), latent_q.dtype),
        grid=grid,
        in_specs=in_specs,
        out_specs=out_spec,
        input_output_aliases={lat_idx: 0},   # write output over the latent copy
        compiler_params=pltpu.CompilerParams(
            dimension_semantics=("parallel",),
            vmem_limit_bytes=vmem_bytes),
    )(*inputs)

    return out2.reshape(B, C, H, W)


def reference(latent_q, entropy_features, params):
    """Pure-JAX NCHW reference of the PyTorch forward."""
    w0, b0, w1, b1, w2, b2 = params

    def conv(x, w, b, pad):
        y = jax.lax.conv_general_dilated(
            x, w, window_strides=(1, 1), padding=[(pad, pad), (pad, pad)],
            dimension_numbers=('NCHW', 'OIHW', 'NCHW'))
        return y + b.reshape(1, -1, 1, 1)

    lrelu = lambda t: jnp.where(t >= 0, t, 0.01 * t)
    z = lrelu(conv(entropy_features, w0, b0, 0))
    r = lrelu(conv(z, w1, b1, 1))
    r = lrelu(conv(r, w2, b2, 1))
    return latent_q + (r + z)


if __name__ == "__main__":
    B, H, W = 2, 16, 16
    num_channels, d_model = 4, 8

    key = jax.random.PRNGKey(0)
    ks = jax.random.split(key, 8)
    # Deterministic synthetic parameters in PyTorch layouts (OIHW).
    w0 = jax.random.normal(ks[0], (num_channels, d_model, 1, 1), jnp.float32) * 0.2
    b0 = jax.random.normal(ks[1], (num_channels,), jnp.float32) * 0.1
    w1 = jax.random.normal(ks[2], (num_channels, num_channels, 3, 3),
                           jnp.float32) * 0.2
    b1 = jax.random.normal(ks[3], (num_channels,), jnp.float32) * 0.1
    w2 = jax.random.normal(ks[4], (num_channels, num_channels, 3, 3),
                           jnp.float32) * 0.2
    b2 = jax.random.normal(ks[5], (num_channels,), jnp.float32) * 0.1
    params = (w0, b0, w1, b1, w2, b2)

    latent_q = jax.random.normal(ks[6], (B, num_channels, H, W), jnp.float32)
    entropy_features = jax.random.normal(ks[7], (B, d_model, H, W), jnp.float32)

    out = jax.block_until_ready(dequantize(latent_q, entropy_features, params))
    ref = reference(latent_q, entropy_features, params)
    assert out.shape == (B, num_channels, H, W)
    err = float(jnp.max(jnp.abs(out - ref)))
    assert jnp.allclose(out, ref, atol=1e-3, rtol=1e-3), err

    # entropy_features=None branch (1x1 conv collapses to its bias; no zero DMA).
    out_none = jax.block_until_ready(dequantize(latent_q, None, params))
    ref_none = reference(latent_q,
                         jnp.zeros((B, d_model, H, W), jnp.float32), params)
    err_none = float(jnp.max(jnp.abs(out_none - ref_none)))
    assert jnp.allclose(out_none, ref_none, atol=1e-3, rtol=1e-3), err_none

    # Multi-step grid (B=4 -> two image blocks) exercising the pipelined path
    # and, on v7x, both TensorCores via the "parallel" grid axis.
    latent4 = jax.random.normal(ks[6], (4, num_channels, H, W), jnp.float32)
    ef4 = jax.random.normal(ks[7], (4, d_model, H, W), jnp.float32)
    out4 = jax.block_until_ready(dequantize(latent4, ef4, params))
    ref4 = reference(latent4, ef4, params)
    err4 = float(jnp.max(jnp.abs(out4 - ref4)))
    assert jnp.allclose(out4, ref4, atol=1e-3, rtol=1e-3), err4

    print("KERNEL_OK")
</pallas_src>

<mosaic_0001>
module attributes {stable_mosaic.version = 11 : i64} {
  func.func @_dequantizer_kernel(%arg0: i32, %arg1: memref<16x256xf32, #tpu.memory_space<vmem>>, %arg2: memref<8x256xf32, #tpu.memory_space<vmem>>, %arg3: memref<8x16xf32, #tpu.memory_space<vmem>>, %arg4: memref<8x1xf32, #tpu.memory_space<vmem>>, %arg5: memref<18x8x8xf32, #tpu.memory_space<vmem>>, %arg6: memref<8x1xf32, #tpu.memory_space<vmem>>, %arg7: memref<8x1xf32, #tpu.memory_space<vmem>>, %arg8: memref<9x8x256xf32, #tpu.memory_space<vmem>>, %arg9: memref<8x256xf32, #tpu.memory_space<vmem>>) attributes {dimension_semantics = [#tpu.dimension_semantics<parallel>], iteration_bounds = array<i64: 1>, scalar_prefetch = 0 : i64, scratch_operands = 0 : i64, tpu.core_type = #tpu.core_type<tc>, window_params = [{transform_indices = @transform_0, window_bounds = array<i64: 16, 256>}, {transform_indices = @transform_1, window_bounds = array<i64: 8, 256>}, {pipeline_mode = #tpu.pipeline_mode<synchronous>, transform_indices = @transform_2, window_bounds = array<i64: 8, 16>}, {pipeline_mode = #tpu.pipeline_mode<synchronous>, transform_indices = @transform_3, window_bounds = array<i64: 8, 1>}, {pipeline_mode = #tpu.pipeline_mode<synchronous>, transform_indices = @transform_4, window_bounds = array<i64: 18, 8, 8>}, {pipeline_mode = #tpu.pipeline_mode<synchronous>, transform_indices = @transform_5, window_bounds = array<i64: 8, 1>}, {pipeline_mode = #tpu.pipeline_mode<synchronous>, transform_indices = @transform_6, window_bounds = array<i64: 8, 1>}, {pipeline_mode = #tpu.pipeline_mode<synchronous>, transform_indices = @transform_7, window_bounds = array<i64: 9, 8, 256>}, {transform_indices = @transform_8, window_bounds = array<i64: 8, 256>}]} {
    %c0 = arith.constant 0 : index
    %c0_0 = arith.constant 0 : index
    %0 = vector.load %arg1[%c0, %c0_0] : memref<16x256xf32, #tpu.memory_space<vmem>>, vector<16x256xf32>
    %c0_1 = arith.constant 0 : index
    %c0_2 = arith.constant 0 : index
    %1 = vector.load %arg3[%c0_1, %c0_2] : memref<8x16xf32, #tpu.memory_space<vmem>>, vector<8x16xf32>
    %cst = arith.constant dense<0.000000e+00> : vector<8x256xf32>
    %2 = tpu.matmul %1, %0, %cst {dimension_numbers = #tpu.dot_dimension_numbers<[1], [0], [0], [1], [0, 0, 1, 1], [], []>} : vector<8x16xf32>, vector<16x256xf32>, vector<8x256xf32> -> vector<8x256xf32>
    %c0_3 = arith.constant 0 : index
    %c0_4 = arith.constant 0 : index
    %3 = vector.load %arg4[%c0_3, %c0_4] : memref<8x1xf32, #tpu.memory_space<vmem>>, vector<8x1xf32>
    %4 = vector.broadcast %3 : vector<8x1xf32> to vector<8x256xf32>
    %5 = arith.addf %2, %4 : vector<8x256xf32>
    %cst_5 = arith.constant 0.00999999977 : f32
    %6 = vector.broadcast %cst_5 : f32 to vector<8x256xf32>
    %7 = arith.mulf %6, %5 : vector<8x256xf32>
    %8 = arith.maximumf %5, %7 : vector<8x256xf32>
    %c17_i32 = arith.constant 17 : i32
    %9 = tpu.dynamic_rotate %8 by %c17_i32 dim 1 : vector<8x256xf32>, i32 -> vector<8x256xf32>
    %c0_6 = arith.constant 0 : index
    %c0_7 = arith.constant 0 : index
    %c0_8 = arith.constant 0 : index
    %10 = vector.load %arg8[%c0_6, %c0_7, %c0_8] : memref<9x8x256xf32, #tpu.memory_space<vmem>>, vector<1x8x256xf32>
    %11 = vector.shape_cast %10 : vector<1x8x256xf32> to vector<8x256xf32>
    %12 = arith.mulf %9, %11 : vector<8x256xf32>
    %c0_9 = arith.constant 0 : index
    %c0_10 = arith.constant 0 : index
    %c0_11 = arith.constant 0 : index
    %13 = vector.load %arg5[%c0_9, %c0_10, %c0_11] : memref<18x8x8xf32, #tpu.memory_space<vmem>>, vector<1x8x8xf32>
    %14 = vector.shape_cast %13 : vector<1x8x8xf32> to vector<8x8xf32>
    %cst_12 = arith.constant dense<0.000000e+00> : vector<8x256xf32>
    %15 = tpu.matmul %14, %12, %cst_12 {dimension_numbers = #tpu.dot_dimension_numbers<[1], [0], [0], [1], [0, 0, 1, 1], [], []>} : vector<8x8xf32>, vector<8x256xf32>, vector<8x256xf32> -> vector<8x256xf32>
    %c16_i32 = arith.constant 16 : i32
    %16 = tpu.dynamic_rotate %8 by %c16_i32 dim 1 : vector<8x256xf32>, i32 -> vector<8x256xf32>
    %c1 = arith.constant 1 : index
    %c0_13 = arith.constant 0 : index
    %c0_14 = arith.constant 0 : index
    %17 = vector.load %arg8[%c1, %c0_13, %c0_14] : memref<9x8x256xf32, #tpu.memory_space<vmem>>, vector<1x8x256xf32>
    %18 = vector.shape_cast %17 : vector<1x8x256xf32> to vector<8x256xf32>
    %19 = arith.mulf %16, %18 : vector<8x256xf32>
    %c1_15 = arith.constant 1 : index
    %c0_16 = arith.constant 0 : index
    %c0_17 = arith.constant 0 : index
    %20 = vector.load %arg5[%c1_15, %c0_16, %c0_17] : memref<18x8x8xf32, #tpu.memory_space<vmem>>, vector<1x8x8xf32>
    %21 = vector.shape_cast %20 : vector<1x8x8xf32> to vector<8x8xf32>
    %cst_18 = arith.constant dense<0.000000e+00> : vector<8x256xf32>
    %22 = tpu.matmul %21, %19, %cst_18 {dimension_numbers = #tpu.dot_dimension_numbers<[1], [0], [0], [1], [0, 0, 1, 1], [], []>} : vector<8x8xf32>, vector<8x256xf32>, vector<8x256xf32> -> vector<8x256xf32>
    %23 = arith.addf %15, %22 : vector<8x256xf32>
    %c15_i32 = arith.constant 15 : i32
    %24 = tpu.dynamic_rotate %8 by %c15_i32 dim 1 : vector<8x256xf32>, i32 -> vector<8x256xf32>
    %c2 = arith.constant 2 : index
    %c0_19 = arith.constant 0 : index
    %c0_20 = arith.constant 0 : index
    %25 = vector.load %arg8[%c2, %c0_19, %c0_20] : memref<9x8x256xf32, #tpu.memory_space<vmem>>, vector<1x8x256xf32>
    %26 = vector.shape_cast %25 : vector<1x8x256xf32> to vector<8x256xf32>
    %27 = arith.mulf %24, %26 : vector<8x256xf32>
    %c2_21 = arith.constant 2 : index
    %c0_22 = arith.constant 0 : index
    %c0_23 = arith.constant 0 : index
    %28 = vector.load %arg5[%c2_21, %c0_22, %c0_23] : memref<18x8x8xf32, #tpu.memory_space<vmem>>, vector<1x8x8xf32>
    %29 = vector.shape_cast %28 : vector<1x8x8xf32> to vector<8x8xf32>
    %cst_24 = arith.constant dense<0.000000e+00> : vector<8x256xf32>
    %30 = tpu.matmul %29, %27, %cst_24 {dimension_numbers = #tpu.dot_dimension_numbers<[1], [0], [0], [1], [0, 0, 1, 1], [], []>} : vector<8x8xf32>, vector<8x256xf32>, vector<8x256xf32> -> vector<8x256xf32>
    %31 = arith.addf %23, %30 : vector<8x256xf32>
    %c1_i32 = arith.constant 1 : i32
    %32 = tpu.dynamic_rotate %8 by %c1_i32 dim 1 : vector<8x256xf32>, i32 -> vector<8x256xf32>
    %c3 = arith.constant 3 : index
    %c0_25 = arith.constant 0 : index
    %c0_26 = arith.constant 0 : index
    %33 = vector.load %arg8[%c3, %c0_25, %c0_26] : memref<9x8x256xf32, #tpu.memory_space<vmem>>, vector<1x8x256xf32>
    %34 = vector.shape_cast %33 : vector<1x8x256xf32> to vector<8x256xf32>
    %35 = arith.mulf %32, %34 : vector<8x256xf32>
    %c3_27 = arith.constant 3 : index
    %c0_28 = arith.constant 0 : index
    %c0_29 = arith.constant 0 : index
    %36 = vector.load %arg5[%c3_27, %c0_28, %c0_29] : memref<18x8x8xf32, #tpu.memory_space<vmem>>, vector<1x8x8xf32>
    %37 = vector.shape_cast %36 : vector<1x8x8xf32> to vector<8x8xf32>
    %cst_30 = arith.constant dense<0.000000e+00> : vector<8x256xf32>
    %38 = tpu.matmul %37, %35, %cst_30 {dimension_numbers = #tpu.dot_dimension_numbers<[1], [0], [0], [1], [0, 0, 1, 1], [], []>} : vector<8x8xf32>, vector<8x256xf32>, vector<8x256xf32> -> vector<8x256xf32>
    %39 = arith.addf %31, %38 : vector<8x256xf32>
    %c4 = arith.constant 4 : index
    %c0_31 = arith.constant 0 : index
    %c0_32 = arith.constant 0 : index
    %40 = vector.load %arg5[%c4, %c0_31, %c0_32] : memref<18x8x8xf32, #tpu.memory_space<vmem>>, vector<1x8x8xf32>
    %41 = vector.shape_cast %40 : vector<1x8x8xf32> to vector<8x8xf32>
    %cst_33 = arith.constant dense<0.000000e+00> : vector<8x256xf32>
    %42 = tpu.matmul %41, %8, %cst_33 {dimension_numbers = #tpu.dot_dimension_numbers<[1], [0], [0], [1], [0, 0, 1, 1], [], []>} : vector<8x8xf32>, vector<8x256xf32>, vector<8x256xf32> -> vector<8x256xf32>
    %43 = arith.addf %39, %42 : vector<8x256xf32>
    %c255_i32 = arith.constant 255 : i32
    %44 = tpu.dynamic_rotate %8 by %c255_i32 dim 1 : vector<8x256xf32>, i32 -> vector<8x256xf32>
    %c5 = arith.constant 5 : index
    %c0_34 = arith.constant 0 : index
    %c0_35 = arith.constant 0 : index
    %45 = vector.load %arg8[%c5, %c0_34, %c0_35] : memref<9x8x256xf32, #tpu.memory_space<vmem>>, vector<1x8x256xf32>
    %46 = vector.shape_cast %45 : vector<1x8x256xf32> to vector<8x256xf32>
    %47 = arith.mulf %44, %46 : vector<8x256xf32>
    %c5_36 = arith.constant 5 : index
    %c0_37 = arith.constant 0 : index
    %c0_38 = arith.constant 0 : index
    %48 = vector.load %arg5[%c5_36, %c0_37, %c0_38] : memref<18x8x8xf32, #tpu.memory_space<vmem>>, vector<1x8x8xf32>
    %49 = vector.shape_cast %48 : vector<1x8x8xf32> to vector<8x8xf32>
    %cst_39 = arith.constant dense<0.000000e+00> : vector<8x256xf32>
    %50 = tpu.matmul %49, %47, %cst_39 {dimension_numbers = #tpu.dot_dimension_numbers<[1], [0], [0], [1], [0, 0, 1, 1], [], []>} : vector<8x8xf32>, vector<8x256xf32>, vector<8x256xf32> -> vector<8x256xf32>
    %51 = arith.addf %43, %50 : vector<8x256xf32>
    %c241_i32 = arith.constant 241 : i32
    %52 = tpu.dynamic_rotate %8 by %c241_i32 dim 1 : vector<8x256xf32>, i32 -> vector<8x256xf32>
    %c6 = arith.constant 6 : index
    %c0_40 = arith.constant 0 : index
    %c0_41 = arith.constant 0 : index
    %53 = vector.load %arg8[%c6, %c0_40, %c0_41] : memref<9x8x256xf32, #tpu.memory_space<vmem>>, vector<1x8x256xf32>
    %54 = vector.shape_cast %53 : vector<1x8x256xf32> to vector<8x256xf32>
    %55 = arith.mulf %52, %54 : vector<8x256xf32>
    %c6_42 = arith.constant 6 : index
    %c0_43 = arith.constant 0 : index
    %c0_44 = arith.constant 0 : index
    %56 = vector.load %arg5[%c6_42, %c0_43, %c0_44] : memref<18x8x8xf32, #tpu.memory_space<vmem>>, vector<1x8x8xf32>
    %57 = vector.shape_cast %56 : vector<1x8x8xf32> to vector<8x8xf32>
    %cst_45 = arith.constant dense<0.000000e+00> : vector<8x256xf32>
    %58 = tpu.matmul %57, %55, %cst_45 {dimension_numbers = #tpu.dot_dimension_numbers<[1], [0], [0], [1], [0, 0, 1, 1], [], []>} : vector<8x8xf32>, vector<8x256xf32>, vector<8x256xf32> -> vector<8x256xf32>
    %59 = arith.addf %51, %58 : vector<8x256xf32>
    %c240_i32 = arith.constant 240 : i32
    %60 = tpu.dynamic_rotate %8 by %c240_i32 dim 1 : vector<8x256xf32>, i32 -> vector<8x256xf32>
    %c7 = arith.constant 7 : index
    %c0_46 = arith.constant 0 : index
    %c0_47 = arith.constant 0 : index
    %61 = vector.load %arg8[%c7, %c0_46, %c0_47] : memref<9x8x256xf32, #tpu.memory_space<vmem>>, vector<1x8x256xf32>
    %62 = vector.shape_cast %61 : vector<1x8x256xf32> to vector<8x256xf32>
    %63 = arith.mulf %60, %62 : vector<8x256xf32>
    %c7_48 = arith.constant 7 : index
    %c0_49 = arith.constant 0 : index
    %c0_50 = arith.constant 0 : index
    %64 = vector.load %arg5[%c7_48, %c0_49, %c0_50] : memref<18x8x8xf32, #tpu.memory_space<vmem>>, vector<1x8x8xf32>
    %65 = vector.shape_cast %64 : vector<1x8x8xf32> to vector<8x8xf32>
    %cst_51 = arith.constant dense<0.000000e+00> : vector<8x256xf32>
    %66 = tpu.matmul %65, %63, %cst_51 {dimension_numbers = #tpu.dot_dimension_numbers<[1], [0], [0], [1], [0, 0, 1, 1], [], []>} : vector<8x8xf32>, vector<8x256xf32>, vector<8x256xf32> -> vector<8x256xf32>
    %67 = arith.addf %59, %66 : vector<8x256xf32>
    %c239_i32 = arith.constant 239 : i32
    %68 = tpu.dynamic_rotate %8 by %c239_i32 dim 1 : vector<8x256xf32>, i32 -> vector<8x256xf32>
    %c8 = arith.constant 8 : index
    %c0_52 = arith.constant 0 : index
    %c0_53 = arith.constant 0 : index
    %69 = vector.load %arg8[%c8, %c0_52, %c0_53] : memref<9x8x256xf32, #tpu.memory_space<vmem>>, vector<1x8x256xf32>
    %70 = vector.shape_cast %69 : vector<1x8x256xf32> to vector<8x256xf32>
    %71 = arith.mulf %68, %70 : vector<8x256xf32>
    %c8_54 = arith.constant 8 : index
    %c0_55 = arith.constant 0 : index
    %c0_56 = arith.constant 0 : index
    %72 = vector.load %arg5[%c8_54, %c0_55, %c0_56] : memref<18x8x8xf32, #tpu.memory_space<vmem>>, vector<1x8x8xf32>
    %73 = vector.shape_cast %72 : vector<1x8x8xf32> to vector<8x8xf32>
    %cst_57 = arith.constant dense<0.000000e+00> : vector<8x256xf32>
    %74 = tpu.matmul %73, %71, %cst_57 {dimension_numbers = #tpu.dot_dimension_numbers<[1], [0], [0], [1], [0, 0, 1, 1], [], []>} : vector<8x8xf32>, vector<8x256xf32>, vector<8x256xf32> -> vector<8x256xf32>
    %75 = arith.addf %67, %74 : vector<8x256xf32>
    %c0_58 = arith.constant 0 : index
    %c0_59 = arith.constant 0 : index
    %76 = vector.load %arg6[%c0_58, %c0_59] : memref<8x1xf32, #tpu.memory_space<vmem>>, vector<8x1xf32>
    %77 = vector.broadcast %76 : vector<8x1xf32> to vector<8x256xf32>
    %78 = arith.addf %75, %77 : vector<8x256xf32>
    %cst_60 = arith.constant 0.00999999977 : f32
    %79 = vector.broadcast %cst_60 : f32 to vector<8x256xf32>
    %80 = arith.mulf %79, %78 : vector<8x256xf32>
    %81 = arith.maximumf %78, %80 : vector<8x256xf32>
    %c17_i32_61 = arith.constant 17 : i32
    %82 = tpu.dynamic_rotate %81 by %c17_i32_61 dim 1 : vector<8x256xf32>, i32 -> vector<8x256xf32>
    %c0_62 = arith.constant 0 : index
    %c0_63 = arith.constant 0 : index
    %c0_64 = arith.constant 0 : index
    %83 = vector.load %arg8[%c0_62, %c0_63, %c0_64] : memref<9x8x256xf32, #tpu.memory_space<vmem>>, vector<1x8x256xf32>
    %84 = vector.shape_cast %83 : vector<1x8x256xf32> to vector<8x256xf32>
    %85 = arith.mulf %82, %84 : vector<8x256xf32>
    %c9 = arith.constant 9 : index
    %c0_65 = arith.constant 0 : index
    %c0_66 = arith.constant 0 : index
    %86 = vector.load %arg5[%c9, %c0_65, %c0_66] : memref<18x8x8xf32, #tpu.memory_space<vmem>>, vector<1x8x8xf32>
    %87 = vector.shape_cast %86 : vector<1x8x8xf32> to vector<8x8xf32>
    %cst_67 = arith.constant dense<0.000000e+00> : vector<8x256xf32>
    %88 = tpu.matmul %87, %85, %cst_67 {dimension_numbers = #tpu.dot_dimension_numbers<[1], [0], [0], [1], [0, 0, 1, 1], [], []>} : vector<8x8xf32>, vector<8x256xf32>, vector<8x256xf32> -> vector<8x256xf32>
    %c16_i32_68 = arith.constant 16 : i32
    %89 = tpu.dynamic_rotate %81 by %c16_i32_68 dim 1 : vector<8x256xf32>, i32 -> vector<8x256xf32>
    %c1_69 = arith.constant 1 : index
    %c0_70 = arith.constant 0 : index
    %c0_71 = arith.constant 0 : index
    %90 = vector.load %arg8[%c1_69, %c0_70, %c0_71] : memref<9x8x256xf32, #tpu.memory_space<vmem>>, vector<1x8x256xf32>
    %91 = vector.shape_cast %90 : vector<1x8x256xf32> to vector<8x256xf32>
    %92 = arith.mulf %89, %91 : vector<8x256xf32>
    %c10 = arith.constant 10 : index
    %c0_72 = arith.constant 0 : index
    %c0_73 = arith.constant 0 : index
    %93 = vector.load %arg5[%c10, %c0_72, %c0_73] : memref<18x8x8xf32, #tpu.memory_space<vmem>>, vector<1x8x8xf32>
    %94 = vector.shape_cast %93 : vector<1x8x8xf32> to vector<8x8xf32>
    %cst_74 = arith.constant dense<0.000000e+00> : vector<8x256xf32>
    %95 = tpu.matmul %94, %92, %cst_74 {dimension_numbers = #tpu.dot_dimension_numbers<[1], [0], [0], [1], [0, 0, 1, 1], [], []>} : vector<8x8xf32>, vector<8x256xf32>, vector<8x256xf32> -> vector<8x256xf32>
    %96 = arith.addf %88, %95 : vector<8x256xf32>
    %c15_i32_75 = arith.constant 15 : i32
    %97 = tpu.dynamic_rotate %81 by %c15_i32_75 dim 1 : vector<8x256xf32>, i32 -> vector<8x256xf32>
    %c2_76 = arith.constant 2 : index
    %c0_77 = arith.constant 0 : index
    %c0_78 = arith.constant 0 : index
    %98 = vector.load %arg8[%c2_76, %c0_77, %c0_78] : memref<9x8x256xf32, #tpu.memory_space<vmem>>, vector<1x8x256xf32>
    %99 = vector.shape_cast %98 : vector<1x8x256xf32> to vector<8x256xf32>
    %100 = arith.mulf %97, %99 : vector<8x256xf32>
    %c11 = arith.constant 11 : index
    %c0_79 = arith.constant 0 : index
    %c0_80 = arith.constant 0 : index
    %101 = vector.load %arg5[%c11, %c0_79, %c0_80] : memref<18x8x8xf32, #tpu.memory_space<vmem>>, vector<1x8x8xf32>
    %102 = vector.shape_cast %101 : vector<1x8x8xf32> to vector<8x8xf32>
    %cst_81 = arith.constant dense<0.000000e+00> : vector<8x256xf32>
    %103 = tpu.matmul %102, %100, %cst_81 {dimension_numbers = #tpu.dot_dimension_numbers<[1], [0], [0], [1], [0, 0, 1, 1], [], []>} : vector<8x8xf32>, vector<8x256xf32>, vector<8x256xf32> -> vector<8x256xf32>
    %104 = arith.addf %96, %103 : vector<8x256xf32>
    %c1_i32_82 = arith.constant 1 : i32
    %105 = tpu.dynamic_rotate %81 by %c1_i32_82 dim 1 : vector<8x256xf32>, i32 -> vector<8x256xf32>
    %c3_83 = arith.constant 3 : index
    %c0_84 = arith.constant 0 : index
    %c0_85 = arith.constant 0 : index
    %106 = vector.load %arg8[%c3_83, %c0_84, %c0_85] : memref<9x8x256xf32, #tpu.memory_space<vmem>>, vector<1x8x256xf32>
    %107 = vector.shape_cast %106 : vector<1x8x256xf32> to vector<8x256xf32>
    %108 = arith.mulf %105, %107 : vector<8x256xf32>
    %c12 = arith.constant 12 : index
    %c0_86 = arith.constant 0 : index
    %c0_87 = arith.constant 0 : index
    %109 = vector.load %arg5[%c12, %c0_86, %c0_87] : memref<18x8x8xf32, #tpu.memory_space<vmem>>, vector<1x8x8xf32>
    %110 = vector.shape_cast %109 : vector<1x8x8xf32> to vector<8x8xf32>
    %cst_88 = arith.constant dense<0.000000e+00> : vector<8x256xf32>
    %111 = tpu.matmul %110, %108, %cst_88 {dimension_numbers = #tpu.dot_dimension_numbers<[1], [0], [0], [1], [0, 0, 1, 1], [], []>} : vector<8x8xf32>, vector<8x256xf32>, vector<8x256xf32> -> vector<8x256xf32>
    %112 = arith.addf %104, %111 : vector<8x256xf32>
    %c13 = arith.constant 13 : index
    %c0_89 = arith.constant 0 : index
    %c0_90 = arith.constant 0 : index
    %113 = vector.load %arg5[%c13, %c0_89, %c0_90] : memref<18x8x8xf32, #tpu.memory_space<vmem>>, vector<1x8x8xf32>
    %114 = vector.shape_cast %113 : vector<1x8x8xf32> to vector<8x8xf32>
    %cst_91 = arith.constant dense<0.000000e+00> : vector<8x256xf32>
    %115 = tpu.matmul %114, %81, %cst_91 {dimension_numbers = #tpu.dot_dimension_numbers<[1], [0], [0], [1], [0, 0, 1, 1], [], []>} : vector<8x8xf32>, vector<8x256xf32>, vector<8x256xf32> -> vector<8x256xf32>
    %116 = arith.addf %112, %115 : vector<8x256xf32>
    %c255_i32_92 = arith.constant 255 : i32
    %117 = tpu.dynamic_rotate %81 by %c255_i32_92 dim 1 : vector<8x256xf32>, i32 -> vector<8x256xf32>
    %c5_93 = arith.constant 5 : index
    %c0_94 = arith.constant 0 : index
    %c0_95 = arith.constant 0 : index
    %118 = vector.load %arg8[%c5_93, %c0_94, %c0_95] : memref<9x8x256xf32, #tpu.memory_space<vmem>>, vector<1x8x256xf32>
    %119 = vector.shape_cast %118 : vector<1x8x256xf32> to vector<8x256xf32>
    %120 = arith.mulf %117, %119 : vector<8x256xf32>
    %c14 = arith.constant 14 : index
    %c0_96 = arith.constant 0 : index
    %c0_97 = arith.constant 0 : index
    %121 = vector.load %arg5[%c14, %c0_96, %c0_97] : memref<18x8x8xf32, #tpu.memory_space<vmem>>, vector<1x8x8xf32>
    %122 = vector.shape_cast %121 : vector<1x8x8xf32> to vector<8x8xf32>
    %cst_98 = arith.constant dense<0.000000e+00> : vector<8x256xf32>
    %123 = tpu.matmul %122, %120, %cst_98 {dimension_numbers = #tpu.dot_dimension_numbers<[1], [0], [0], [1], [0, 0, 1, 1], [], []>} : vector<8x8xf32>, vector<8x256xf32>, vector<8x256xf32> -> vector<8x256xf32>
    %124 = arith.addf %116, %123 : vector<8x256xf32>
    %c241_i32_99 = arith.constant 241 : i32
    %125 = tpu.dynamic_rotate %81 by %c241_i32_99 dim 1 : vector<8x256xf32>, i32 -> vector<8x256xf32>
    %c6_100 = arith.constant 6 : index
    %c0_101 = arith.constant 0 : index
    %c0_102 = arith.constant 0 : index
    %126 = vector.load %arg8[%c6_100, %c0_101, %c0_102] : memref<9x8x256xf32, #tpu.memory_space<vmem>>, vector<1x8x256xf32>
    %127 = vector.shape_cast %126 : vector<1x8x256xf32> to vector<8x256xf32>
    %128 = arith.mulf %125, %127 : vector<8x256xf32>
    %c15 = arith.constant 15 : index
    %c0_103 = arith.constant 0 : index
    %c0_104 = arith.constant 0 : index
    %129 = vector.load %arg5[%c15, %c0_103, %c0_104] : memref<18x8x8xf32, #tpu.memory_space<vmem>>, vector<1x8x8xf32>
    %130 = vector.shape_cast %129 : vector<1x8x8xf32> to vector<8x8xf32>
    %cst_105 = arith.constant dense<0.000000e+00> : vector<8x256xf32>
    %131 = tpu.matmul %130, %128, %cst_105 {dimension_numbers = #tpu.dot_dimension_numbers<[1], [0], [0], [1], [0, 0, 1, 1], [], []>} : vector<8x8xf32>, vector<8x256xf32>, vector<8x256xf32> -> vector<8x256xf32>
    %132 = arith.addf %124, %131 : vector<8x256xf32>
    %c240_i32_106 = arith.constant 240 : i32
    %133 = tpu.dynamic_rotate %81 by %c240_i32_106 dim 1 : vector<8x256xf32>, i32 -> vector<8x256xf32>
    %c7_107 = arith.constant 7 : index
    %c0_108 = arith.constant 0 : index
    %c0_109 = arith.constant 0 : index
    %134 = vector.load %arg8[%c7_107, %c0_108, %c0_109] : memref<9x8x256xf32, #tpu.memory_space<vmem>>, vector<1x8x256xf32>
    %135 = vector.shape_cast %134 : vector<1x8x256xf32> to vector<8x256xf32>
    %136 = arith.mulf %133, %135 : vector<8x256xf32>
    %c16 = arith.constant 16 : index
    %c0_110 = arith.constant 0 : index
    %c0_111 = arith.constant 0 : index
    %137 = vector.load %arg5[%c16, %c0_110, %c0_111] : memref<18x8x8xf32, #tpu.memory_space<vmem>>, vector<1x8x8xf32>
    %138 = vector.shape_cast %137 : vector<1x8x8xf32> to vector<8x8xf32>
    %cst_112 = arith.constant dense<0.000000e+00> : vector<8x256xf32>
    %139 = tpu.matmul %138, %136, %cst_112 {dimension_numbers = #tpu.dot_dimension_numbers<[1], [0], [0], [1], [0, 0, 1, 1], [], []>} : vector<8x8xf32>, vector<8x256xf32>, vector<8x256xf32> -> vector<8x256xf32>
    %140 = arith.addf %132, %139 : vector<8x256xf32>
    %c239_i32_113 = arith.constant 239 : i32
    %141 = tpu.dynamic_rotate %81 by %c239_i32_113 dim 1 : vector<8x256xf32>, i32 -> vector<8x256xf32>
    %c8_114 = arith.constant 8 : index
    %c0_115 = arith.constant 0 : index
    %c0_116 = arith.constant 0 : index
    %142 = vector.load %arg8[%c8_114, %c0_115, %c0_116] : memref<9x8x256xf32, #tpu.memory_space<vmem>>, vector<1x8x256xf32>
    %143 = vector.shape_cast %142 : vector<1x8x256xf32> to vector<8x256xf32>
    %144 = arith.mulf %141, %143 : vector<8x256xf32>
    %c17 = arith.constant 17 : index
    %c0_117 = arith.constant 0 : index
    %c0_118 = arith.constant 0 : index
    %145 = vector.load %arg5[%c17, %c0_117, %c0_118] : memref<18x8x8xf32, #tpu.memory_space<vmem>>, vector<1x8x8xf32>
    %146 = vector.shape_cast %145 : vector<1x8x8xf32> to vector<8x8xf32>
    %cst_119 = arith.constant dense<0.000000e+00> : vector<8x256xf32>
    %147 = tpu.matmul %146, %144, %cst_119 {dimension_numbers = #tpu.dot_dimension_numbers<[1], [0], [0], [1], [0, 0, 1, 1], [], []>} : vector<8x8xf32>, vector<8x256xf32>, vector<8x256xf32> -> vector<8x256xf32>
    %148 = arith.addf %140, %147 : vector<8x256xf32>
    %c0_120 = arith.constant 0 : index
    %c0_121 = arith.constant 0 : index
    %149 = vector.load %arg7[%c0_120, %c0_121] : memref<8x1xf32, #tpu.memory_space<vmem>>, vector<8x1xf32>
    %150 = vector.broadcast %149 : vector<8x1xf32> to vector<8x256xf32>
    %151 = arith.addf %148, %150 : vector<8x256xf32>
    %cst_122 = arith.constant 0.00999999977 : f32
    %152 = vector.broadcast %cst_122 : f32 to vector<8x256xf32>
    %153 = arith.mulf %152, %151 : vector<8x256xf32>
    %154 = arith.maximumf %151, %153 : vector<8x256xf32>
    %c0_123 = arith.constant 0 : index
    %c0_124 = arith.constant 0 : index
    %155 = vector.load %arg2[%c0_123, %c0_124] : memref<8x256xf32, #tpu.memory_space<vmem>>, vector<8x256xf32>
    %156 = arith.addf %155, %154 : vector<8x256xf32>
    %157 = arith.addf %156, %8 : vector<8x256xf32>
    %c0_125 = arith.constant 0 : index
    %c0_126 = arith.constant 0 : index
    %158 = vector.load %arg9[%c0_125, %c0_126] : memref<8x256xf32, #tpu.memory_space<vmem>>, vector<8x256xf32>
    tpu.vector_store %arg9[%c0_125, %c0_126], %157 {strides = array<i32>} : memref<8x256xf32, #tpu.memory_space<vmem>>, vector<8x256xf32>,
    return
  }
  func.func @transform_0(%arg0: i32) -> (i32, i32) {
    %c0_i32 = arith.constant 0 : i32
    %c0_i32_0 = arith.constant 0 : i32
    return %arg0, %c0_i32 : i32, i32
  }
  func.func @transform_1(%arg0: i32) -> (i32, i32) {
    %c0_i32 = arith.constant 0 : i32
    %c0_i32_0 = arith.constant 0 : i32
    return %arg0, %c0_i32 : i32, i32
  }
  func.func @transform_2(%arg0: i32) -> (i32, i32) {
    %c0_i32 = arith.constant 0 : i32
    %c0_i32_0 = arith.constant 0 : i32
    %c0_i32_1 = arith.constant 0 : i32
    return %c0_i32, %c0_i32_0 : i32, i32
  }
  func.func @transform_3(%arg0: i32) -> (i32, i32) {
    %c0_i32 = arith.constant 0 : i32
    %c0_i32_0 = arith.constant 0 : i32
    %c0_i32_1 = arith.constant 0 : i32
    return %c0_i32, %c0_i32_0 : i32, i32
  }
  func.func @transform_4(%arg0: i32) -> (i32, i32, i32) {
    %c0_i32 = arith.constant 0 : i32
    %c0_i32_0 = arith.constant 0 : i32
    %c0_i32_1 = arith.constant 0 : i32
    %c0_i32_2 = arith.constant 0 : i32
    return %c0_i32, %c0_i32_0, %c0_i32_1 : i32, i32, i32
  }
  func.func @transform_5(%arg0: i32) -> (i32, i32) {
    %c0_i32 = arith.constant 0 : i32
    %c0_i32_0 = arith.constant 0 : i32
    %c0_i32_1 = arith.constant 0 : i32
    return %c0_i32, %c0_i32_0 : i32, i32
  }
  func.func @transform_6(%arg0: i32) -> (i32, i32) {
    %c0_i32 = arith.constant 0 : i32
    %c0_i32_0 = arith.constant 0 : i32
    %c0_i32_1 = arith.constant 0 : i32
    return %c0_i32, %c0_i32_0 : i32, i32
  }
  func.func @transform_7(%arg0: i32) -> (i32, i32, i32) {
    %c0_i32 = arith.constant 0 : i32
    %c0_i32_0 = arith.constant 0 : i32
    %c0_i32_1 = arith.constant 0 : i32
    %c0_i32_2 = arith.constant 0 : i32
    return %c0_i32, %c0_i32_0, %c0_i32_1 : i32, i32, i32
  }
  func.func @transform_8(%arg0: i32) -> (i32, i32) {
    %c0_i32 = arith.constant 0 : i32
    %c0_i32_0 = arith.constant 0 : i32
    return %arg0, %c0_i32 : i32, i32
  }
}

</mosaic_0001>

<bundles_post_ra>
// kernel: tpu_custom_call.1
= control target key start
LH: loop header
LB: loop body
LE: loop exit
PB: predicated region body
PF: predicated region fallthrough
CT: control target
= control target key end

     0   :  { %13 = vsyncpa [#allocation3], 0  ;;  %s2322_s0 = inlined_call_operand.vmem [shape: f32[16,256], index: 0, kind: input, shape index: {}]   ;;  %s2323_s1 = inlined_call_operand.hbm [shape: f32[8,256], index: 1, kind: input, shape index: {}, may-alias: {1,8}]   ;;  %s2324_s2 = inlined_call_operand.vmem [shape: f32[8,16], index: 2, kind: input, shape index: {}]   ;;  %s2325_s3 = inlined_call_operand.vmem [shape: f32[8,1], index: 3, kind: input, shape index: {}]   ;;  %s2326_s4 = inlined_call_operand.vmem [shape: f32[18,8,8], index: 4, kind: input, shape index: {}]   ;;  %s2327_s5 = inlined_call_operand.vmem [shape: f32[8,1], index: 5, kind: input, shape index: {}]   ;;  %s2328_s6 = inlined_call_operand.vmem [shape: f32[8,1], index: 6, kind: input, shape index: {}]   ;;  %s2329_s7 = inlined_call_operand.vmem [shape: f32[9,8,256], index: 7, kind: input, shape index: {}]   ;;  %s2330_s8 = inlined_call_operand.hbm [shape: f32[8,256], index: 8, kind: output, shape index: {}, may-alias: {1,8}]  }
   0x1   :  { %14 = vsyncpa [#allocation4], 0  ;;  %s1884_s27 = smov [#allocation2]   ;;  %s1836_s9 = scalar_lea.hbm %s2323_s1, 256 }
   0x2   :  { %s23_s28 = sshll.u32 %s1884_s27, 4  ;;  %p1837_p0 = scmp.ne.s32.totalorder %s2323_s1, %s1836_s9  ;;  %s24_s28 = int_to_ptr.vmem [resolvable:$true] %s23_s28 }
   0x3   :  { %p1840_p1 = scmp.lt.u32.totalorder %s1836_s9, %s2323_s1 }
   0x5   :  { %p1842_p2 = pnand %p1840_p1, %p1837_p0 }
   0x7   :  { %1845 = shalt.err (!%p1842_p2)
}
   0x8   :  { %s1846_s14 = scalar_lea.vmem %s24_s28, 256  ;;  %p1851_p4 = scmp.lt.s32.totalorder %s24_s28, %s24_s28 }
   0x9   :  { %p1847_p3 = scmp.ne.s32.totalorder %s24_s28, %s1846_s14  ;;  %p1852_p5 = scmp.lt.s32.totalorder %s1846_s14, %s1846_s14 }
   0xb   :  { %p1853_p6 = por %p1852_p5, %p1851_p4 }
   0xd   :  { %p1854_p7 = pnand %p1853_p6, %p1847_p3 }
   0xf   :  { %1857 = shalt.err (!%p1854_p7)
}
  0x10   :  { %26 = dma.hbm_to_vmem [thread:$0]  %s2323_s1, 256, %s24_s28, [#allocation3]  }
  0x11   :  { %1880 = dma.done.wait [#allocation3], 256  }
  0x12   :  { %1881 = vsyncadd [#allocation3], 4294967040  ;;  %v1885_v0 = vmov 0.0   ;;  %v1886_v1 = vmov 0   ;;  %v43_v2 = vld [vmem:[%s2322_s0 + $0x8] sm:$0xff]  ;;  %v45_v3 = vld [vmem:[%s2322_s0 + $0x18] sm:$0xff]  ;;  %v136_v20 = vlaneseq }
  0x13   :  { %121 = vmatprep.mubr.f32.mxu0 %v1885_v0  ;;  %1834 = vset.pattern.permute.xlu0 %v1886_v1  ;;  %v42_v4 = vld [vmem:[%s2322_s0] sm:$0xff]  ;;  %v1786_v5 = vpack.c.bf16 %v45_v3, %v43_v2  ;;  %v44_v6 = vld [vmem:[%s2322_s0 + $0x10] sm:$0xff]  ;;  %vm53_vm0 = vcmask 130048   ;;  %s1887_s0 = smov 16   ;;  %s1890_s28 = smov 1   ;;  %v2019_v23 = vld [vmem:[%s2329_s7 + $0x18] sm:$0xff] }
  0x14   :  { %228 = vmatprep.mubr.f32.mxu1 %v1885_v0  ;;  %1835 = vset.pattern.permute.xlu1 %v1886_v1  ;;  %v47_v7 = vld [vmem:[%s2325_s3] sm:$0xff]  ;;  %v1788_v8 = vpack.c.bf16 %v44_v6, %v42_v4  ;;  %s1889_s3 = smov 15   ;;  %s1891_s29 = smov 127   ;;  %v2013_v21 = vand.u32 127, %v136_v20  ;;  %v2024_v24 = vld [vmem:[%s2329_s7 + $0x10] sm:$0xff]  ;;  %v2041_v32 = vld [vmem:[%s2329_s7 + $0x8] sm:$0xff] }
  0x15   :  { %50 = vperm.xlu0 %1834, %v47_v7   ;;  %1787 = vmatprep.subr.bf16.mxu0 %v1786_v5  ;;  %v46_v9 = vld [vmem:[%s2324_s2] sm:$0xff]  ;;  %s1888_s2 = smov 17   ;;  %s1892_s30 = smov 113   ;;  %v1739_v33 = vld [vmem:[%s2326_s4 + $0x8] sm:$0xff]  ;;  %vm160_vm3 = vcmask 64512   ;;  %v2074_v47 = vld [vmem:[%s2329_s7 + $0x38] sm:$0xff] }
  0x16   :  { %1789 = vmatpush1.bf16.msra.mxu0 %v1788_v8  ;;  %s1893_s9 = smov 112   ;;  %s1894_s10 = smov 111   ;;  %v927_v19 = vld [vmem:[%s2327_s5] sm:$0xff]  ;;  %vm150_vm1 = vcmp.lt.s32.totalorder %v2013_v21, 16  ;;  %vm138_vm2 = vcmp.lt.s32.totalorder %v2013_v21, 17  ;;  %vm313_vm4 = vcmp.lt.s32.totalorder %v2013_v21, 15 }
  0x17   :  { %v2036_v31 = vld [vmem:[%s2329_s7] sm:$0xff]  ;;  %v2057_v40 = vld [vmem:[%s2329_s7 + $0x28] sm:$0xff]  ;;  %vm403_vm5 = vcmp.lt.s32.totalorder %v2013_v21, 1  ;;  %v2088_v53 = vld [vmem:[%s2329_s7 + $0x30] sm:$0xff]  ;;  %vm571_vm6 = vcmp.lt.s32.totalorder %v2013_v21, 127  ;;  %vm661_vm7 = vcmp.lt.s32.totalorder %v2013_v21, 113 }
  0x18   :  { %v2065_v43 = vld [vmem:[%s2329_s7 + $0x20] sm:$0xff]  ;;  %v1744_v55 = vld [vmem:[%s2326_s4 + $0x10] sm:$0xff]  ;;  %v2103_v59 = vld [vmem:[%s2329_s7 + $0x58] sm:$0xff]  ;;  %vm751_vm8 = vcmp.lt.s32.totalorder %v2013_v21, 112  ;;  %vm841_vm9 = vcmp.lt.s32.totalorder %v2013_v21, 111  ;;  %s1895_s16 = smov [#allocation5]  }
  0x19   :  { %1736 = vmatmul.mubr.msk.f32.vlgmr.msra.gmra.mrb[0].mxu0 %vm53_vm0, %v46_v9  ;;  %v145_v48 = vld [vmem:[%s2326_s4] sm:$0xff]  ;;  %v1748_v61 = vld [vmem:[%s2326_s4 + $0x18] sm:$0xff]  ;;  %v2118_v2 = vld [vmem:[%s2329_s7 + $0x50] sm:$0xff] }
  0x1a   :  { %1100 = vmatprep.mubr.f32.mxu0 %v1885_v0  ;;  %v2125_v4 = vld [vmem:[%s2329_s7 + $0x68] sm:$0xff]  ;;  %v1750_v6 = vld [vmem:[%s2326_s4 + $0x20] sm:$0xff] }
  0x94   :  { %v51_v10 = vpop.permute.xlu0 %50 }
  0xec   :  { %v123_v11 = vpop.f32.mrb[0].mxu0 }
  0xed   :  { %v124_v12 = vadd.f32 %v123_v11, %v51_v10  ;;  %v125_v13 = vpop.f32.mrb[1].mxu0  ;;  %v2140_v11 = vld [vmem:[%s2329_s7 + $0x60] sm:$0xff] }
  0xee   :  { %v126_v14 = vadd.f32 %v125_v13, %v51_v10  ;;  %v2147_v13 = vld [vmem:[%s2329_s7 + $0x78] sm:$0xff] }
  0xef   :  { %v128_v15 = vmul.f32 0.01, %v124_v12 }
  0xf0   :  { %v129_v16 = vmul.f32 0.01, %v126_v14 }
  0xf1   :  { %v1974_v17 = vmax.f32 %v124_v12, %v128_v15  ;;  %v1754_v15 = vld [vmem:[%s2326_s4 + $0x28] sm:$0xff] }
  0xf2   :  { %v1976_v18 = vmax.f32 %v126_v14, %v129_v16 }
  0xf3   :  { %146 = vrot.lane.b32.xlu0 %v1974_v17, %s1887_s0 }
  0xf4   :  { %148 = vrot.lane.b32.xlu1 %v1976_v18, %s1887_s0 }
  0xf7   :  { %134 = vrot.lane.b32.xlu0 %v1976_v18, %s1888_s2 }
  0xf8   :  { %132 = vrot.lane.b32.xlu1 %v1974_v17, %s1888_s2 }
  0xfb   :  { %311 = vrot.lane.b32.xlu0 %v1976_v18, %s1889_s3 }
  0xfc   :  { %309 = vrot.lane.b32.xlu1 %v1974_v17, %s1889_s3 }
  0xff   :  { %401 = vrot.lane.b32.xlu0 %v1976_v18, %s1890_s28 }
 0x100   :  { %399 = vrot.lane.b32.xlu1 %v1974_v17, %s1890_s28 }
 0x103   :  { %569 = vrot.lane.b32.xlu0 %v1976_v18, %s1891_s29 }
 0x104   :  { %567 = vrot.lane.b32.xlu1 %v1974_v17, %s1891_s29 }
 0x107   :  { %659 = vrot.lane.b32.xlu0 %v1976_v18, %s1892_s30 }
 0x108   :  { %657 = vrot.lane.b32.xlu1 %v1974_v17, %s1892_s30 }
 0x10b   :  { %749 = vrot.lane.b32.xlu0 %v1976_v18, %s1893_s9 }
 0x10c   :  { %747 = vrot.lane.b32.xlu1 %v1974_v17, %s1893_s9 }
 0x10f   :  { %839 = vrot.lane.b32.xlu0 %v1976_v18, %s1894_s10 }
 0x110   :  { %837 = vrot.lane.b32.xlu1 %v1974_v17, %s1894_s10 }
 0x114   :  { %930 = vperm.xlu1 %1835, %v927_v19  }
 0x165   :  { %v147_v22 = vpop.permute.xlu0 %146 }
 0x166   :  { %v149_v25 = vpop.permute.xlu1 %148 }
 0x167   :  { %v152_v26 = vsel %vm150_vm1, %v149_v25, %v147_v22  ;;  %v151_v27 = vsel %vm150_vm1, %v147_v22, %v149_v25  ;;  %v2162_v25 = vld [vmem:[%s2329_s7 + $0x70] sm:$0xff] }
 0x168   :  { %v157_v28 = vmul.f32 %v2019_v23, %v151_v27  ;;  %v156_v29 = vmul.f32 %v2024_v24, %v152_v26  ;;  %v2169_v27 = vld [vmem:[%s2329_s7 + $0x88] sm:$0xff] }
 0x169   :  { %v135_v30 = vpop.permute.xlu0 %134 }
 0x16a   :  { %v133_v34 = vpop.permute.xlu1 %132  ;;  %164 = vmatprep.subr.mxu1 %v157_v28 }
 0x16b   :  { %v139_v35 = vsel %vm138_vm2, %v133_v34, %v135_v30  ;;  %v140_v36 = vsel %vm138_vm2, %v135_v30, %v133_v34  ;;  %165 = vmatpush1.msra.mxu1 %v156_v29  ;;  %v1758_v29 = vld [vmem:[%s2326_s4 + $0x30] sm:$0xff]  ;;  %v2183_v34 = vld [vmem:[%s2329_s7 + $0x80] sm:$0xff] }
 0x16c   :  { %v143_v37 = vmul.f32 %v2036_v31, %v140_v36  ;;  %v144_v38 = vmul.f32 %v2041_v32, %v139_v35  ;;  %1740 = vmatmul.mubr.msk.f32.vlgmr.msra.gmra.mrb[0].mxu1 %vm160_vm3, %v1739_v33  ;;  %v1762_v36 = vld [vmem:[%s2326_s4 + $0x38] sm:$0xff] }
 0x16d   :  { %v312_v39 = vpop.permute.xlu0 %311  ;;  %302 = vmatprep.mubr.f32.mxu1 %v1885_v0 }
 0x16e   :  { %v310_v41 = vpop.permute.xlu1 %309  ;;  %238 = vmatprep.subr.mxu1 %v144_v38  ;;  %v1766_v38 = vld [vmem:[%s2326_s4 + $0x40] sm:$0xff] }
 0x16f   :  { %v314_v42 = vsel %vm313_vm4, %v310_v41, %v312_v39  ;;  %239 = vmatpush1.msra.mxu1 %v143_v37  ;;  %v315_v44 = vsel %vm313_vm4, %v312_v39, %v310_v41 }
 0x170   :  { %v320_v45 = vmul.f32 %v2057_v40, %v314_v42  ;;  %v319_v50 = vmul.f32 %v2065_v43, %v315_v44 }
 0x171   :  { %v402_v46 = vpop.permute.xlu0 %401 }
 0x172   :  { %v400_v49 = vpop.permute.xlu1 %399  ;;  %326 = vmatprep.subr.mxu1 %v320_v45 }
 0x173   :  { %v404_v51 = vsel %vm403_vm5, %v400_v49, %v402_v46  ;;  %v405_v54 = vsel %vm403_vm5, %v402_v46, %v400_v49 }
 0x174   :  { %v410_v52 = vmul.f32 %v2074_v47, %v404_v51  ;;  %1741 = vmatmul.mubr.msk.f32.vlgmr.msra.gmra.mrb[0].mxu1 %vm160_vm3, %v145_v48  ;;  %v409_v56 = vmul.f32 %v2088_v53, %v405_v54  ;;  %v1701_v51 = vld [vmem:[%s2328_s6] sm:$0xff] }
 0x175   :  { %327 = vmatpush1.msra.mxu1 %v319_v50  ;;  %390 = vmatprep.mubr.f32.mxu1 %v1885_v0  ;;  %v570_v57 = vpop.permute.xlu0 %569 }
 0x176   :  { %416 = vmatprep.subr.mxu1 %v410_v52  ;;  %v568_v58 = vpop.permute.xlu1 %567 }
 0x177   :  { %v573_v60 = vsel %vm571_vm6, %v570_v57, %v568_v58  ;;  %v572_v3 = vsel %vm571_vm6, %v568_v58, %v570_v57 }
 0x178   :  { %v578_v62 = vmul.f32 %v2103_v59, %v573_v60  ;;  %v577_v7 = vmul.f32 %v2118_v2, %v572_v3 }
 0x179   :  { %v660_v63 = vpop.permute.xlu0 %659 }
 0x17a   :  { %v658_v1 = vpop.permute.xlu1 %657 }
 0x17b   :  { %v663_v5 = vsel %vm661_vm7, %v660_v63, %v658_v1  ;;  %v662_v12 = vsel %vm661_vm7, %v658_v1, %v660_v63 }
 0x17c   :  { %1745 = vmatmul.mubr.msk.f32.vlgmr.msra.gmra.mrb[0].mxu1 %vm160_vm3, %v1744_v55  ;;  %v668_v8 = vmul.f32 %v2125_v4, %v663_v5  ;;  %v667_v16 = vmul.f32 %v2140_v11, %v662_v12 }
 0x17d   :  { %417 = vmatpush1.msra.mxu1 %v409_v56  ;;  %480 = vmatprep.mubr.f32.mxu1 %v1885_v0  ;;  %v750_v9 = vpop.permute.xlu0 %749 }
 0x17e   :  { %494 = vmatprep.subr.mxu1 %v1976_v18  ;;  %v748_v10 = vpop.permute.xlu1 %747 }
 0x17f   :  { %v753_v14 = vsel %vm751_vm8, %v750_v9, %v748_v10  ;;  %v752_v26 = vsel %vm751_vm8, %v748_v10, %v750_v9 }
 0x180   :  { %v758_v19 = vmul.f32 %v2147_v13, %v753_v14  ;;  %v757_v30 = vmul.f32 %v2162_v25, %v752_v26 }
 0x181   :  { %v840_v20 = vpop.permute.xlu0 %839 }
 0x182   :  { %v838_v22 = vpop.permute.xlu1 %837 }
 0x183   :  { %v843_v28 = vsel %vm841_vm9, %v840_v20, %v838_v22  ;;  %v842_v35 = vsel %vm841_vm9, %v838_v22, %v840_v20 }
 0x184   :  { %1749 = vmatmul.mubr.msk.f32.vlgmr.msra.gmra.mrb[0].mxu1 %vm160_vm3, %v1748_v61  ;;  %v848_v33 = vmul.f32 %v2169_v27, %v843_v28  ;;  %v847_v37 = vmul.f32 %v2183_v34, %v842_v35  ;;  %v1768_v61 = vld [vmem:[%s2326_s4 + $0x48] sm:$0xff] }
 0x185   :  { %495 = vmatpush1.msra.mxu1 %v1974_v17  ;;  %558 = vmatprep.mubr.f32.mxu1 %v1885_v0  ;;  %v1776_v35 = vld [vmem:[%s2326_s4 + $0x68] sm:$0xff] }
 0x186   :  { %584 = vmatprep.subr.mxu1 %v578_v62 }
 0x18c   :  { %1751 = vmatmul.mubr.msk.f32.vlgmr.msra.gmra.mrb[0].mxu1 %vm160_vm3, %v1750_v6 }
 0x18d   :  { %585 = vmatpush1.msra.mxu1 %v577_v7  ;;  %648 = vmatprep.mubr.f32.mxu1 %v1885_v0 }
 0x18e   :  { %674 = vmatprep.subr.mxu1 %v668_v8 }
 0x193   :  { %v931_v39 = vpop.permute.xlu1 %930 }
 0x194   :  { %1755 = vmatmul.mubr.msk.f32.vlgmr.msra.gmra.mrb[0].mxu1 %vm160_vm3, %v1754_v15 }
 0x195   :  { %675 = vmatpush1.msra.mxu1 %v667_v16  ;;  %738 = vmatprep.mubr.f32.mxu1 %v1885_v0  ;;  %v1774_v16 = vld [vmem:[%s2326_s4 + $0x60] sm:$0xff] }
 0x196   :  { %764 = vmatprep.subr.mxu1 %v758_v19 }
 0x19c   :  { %1759 = vmatmul.mubr.msk.f32.vlgmr.msra.gmra.mrb[0].mxu1 %vm160_vm3, %v1758_v29 }
 0x19d   :  { %765 = vmatpush1.msra.mxu1 %v757_v30  ;;  %828 = vmatprep.mubr.f32.mxu1 %v1885_v0 }
 0x19e   :  { %854 = vmatprep.subr.mxu1 %v848_v33 }
 0x1a4   :  { %1763 = vmatmul.mubr.msk.f32.vlgmr.msra.gmra.mrb[0].mxu1 %vm160_vm3, %v1762_v36  ;;  %v1769_v36 = vld [vmem:[%s2326_s4 + $0x50] sm:$0xff] }
 0x1a5   :  { %855 = vmatpush1.msra.mxu1 %v847_v37  ;;  %918 = vmatprep.mubr.f32.mxu1 %v1885_v0 }
 0x1ac   :  { %1767 = vmatmul.mubr.msk.f32.vlgmr.msra.gmra.mrb[0].mxu1 %vm160_vm3, %v1766_v38 }
 0x1ad   :  { %1026 = vmatprep.mubr.f32.mxu1 %v1885_v0 }
 0x27f   :  { %v920_v41 = vpop.f32.mrb[0].mxu1 }
 0x280   :  { %v933_v42 = vadd.f32 %v931_v39, %v920_v41  ;;  %v922_v44 = vpop.f32.mrb[1].mxu1 }
 0x281   :  { %v934_v45 = vadd.f32 %v931_v39, %v922_v44 }
 0x282   :  { %v935_v46 = vmul.f32 0.01, %v933_v42 }
 0x283   :  { %v936_v48 = vmul.f32 0.01, %v934_v45 }
 0x284   :  { %v937_v49 = vmax.f32 %v933_v42, %v935_v46 }
 0x285   :  { %v938_v50 = vmax.f32 %v934_v45, %v936_v48 }
 0x286   :  { %939 = vrot.lane.b32.xlu0 %v937_v49, %s1888_s2 }
 0x287   :  { %941 = vrot.lane.b32.xlu1 %v938_v50, %s1888_s2 }
 0x28a   :  { %1107 = vrot.lane.b32.xlu0 %v937_v49, %s1889_s3 }
 0x28b   :  { %1109 = vrot.lane.b32.xlu1 %v938_v50, %s1889_s3 }
 0x28e   :  { %1193 = vrot.lane.b32.xlu0 %v937_v49, %s1890_s28 }
 0x28f   :  { %1195 = vrot.lane.b32.xlu1 %v938_v50, %s1890_s28 }
 0x292   :  { %1357 = vrot.lane.b32.xlu0 %v937_v49, %s1891_s29 }
 0x293   :  { %1359 = vrot.lane.b32.xlu1 %v938_v50, %s1891_s29 }
 0x296   :  { %1443 = vrot.lane.b32.xlu0 %v937_v49, %s1892_s30 }
 0x297   :  { %1445 = vrot.lane.b32.xlu1 %v938_v50, %s1892_s30 }
 0x29a   :  { %1529 = vrot.lane.b32.xlu0 %v937_v49, %s1893_s9 }
 0x29b   :  { %1531 = vrot.lane.b32.xlu1 %v938_v50, %s1893_s9 }
 0x29e   :  { %949 = vrot.lane.b32.xlu0 %v937_v49, %s1887_s0 }
 0x29f   :  { %951 = vrot.lane.b32.xlu1 %v938_v50, %s1887_s0 }
 0x2a2   :  { %1615 = vrot.lane.b32.xlu0 %v937_v49, %s1894_s10 }
 0x2a3   :  { %1617 = vrot.lane.b32.xlu1 %v938_v50, %s1894_s10 }
 0x2a6   :  { %1704 = vperm.xlu0 %1834, %v1701_v51  }
 0x2f8   :  { %v940_v52 = vpop.permute.xlu0 %939 }
 0x2f9   :  { %v942_v54 = vpop.permute.xlu1 %941 }
 0x2fa   :  { %v943_v55 = vsel %vm138_vm2, %v940_v52, %v942_v54  ;;  %v944_v56 = vsel %vm138_vm2, %v942_v54, %v940_v52 }
 0x2fb   :  { %v945_v57 = vmul.f32 %v944_v56, %v2036_v31  ;;  %v946_v58 = vmul.f32 %v943_v55, %v2041_v32 }
 0x2fc   :  { %v1108_v60 = vpop.permute.xlu0 %1107 }
 0x2fd   :  { %1036 = vmatprep.subr.mxu0 %v946_v58  ;;  %v1110_v62 = vpop.permute.xlu1 %1109 }
 0x2fe   :  { %v1111_v63 = vsel %vm313_vm4, %v1108_v60, %v1110_v62  ;;  %v1112_v1 = vsel %vm313_vm4, %v1110_v62, %v1108_v60  ;;  %1037 = vmatpush1.msra.mxu0 %v945_v57  ;;  %v1713_v60 = vld [vmem:[#allocation2] sm:$0xff] }
 0x2ff   :  { %v1113_v3 = vmul.f32 %v2065_v43, %v1112_v1  ;;  %v1114_v31 = vmul.f32 %v2057_v40, %v1111_v63  ;;  %1771 = vmatmul.mubr.msk.f32.vlgmr.msra.gmra.mrb[2].mxu0 %vm160_vm3, %v1768_v61  ;;  %v1772_v40 = vld [vmem:[%s2326_s4 + $0x58] sm:$0xff] }
 0x300   :  { %v1194_v32 = vpop.permute.xlu0 %1193  ;;  %1184 = vmatprep.mubr.f32.mxu0 %v1885_v0 }
 0x301   :  { %1120 = vmatprep.subr.mxu0 %v1114_v31  ;;  %v1196_v5 = vpop.permute.xlu1 %1195 }
 0x302   :  { %v1197_v6 = vsel %vm403_vm5, %v1194_v32, %v1196_v5  ;;  %1121 = vmatpush1.msra.mxu0 %v1113_v3  ;;  %v1198_v7 = vsel %vm403_vm5, %v1196_v5, %v1194_v32 }
 0x303   :  { %v1200_v8 = vmul.f32 %v2074_v47, %v1197_v6  ;;  %v1199_v10 = vmul.f32 %v2088_v53, %v1198_v7 }
 0x304   :  { %v1358_v9 = vpop.permute.xlu0 %1357 }
 0x305   :  { %1206 = vmatprep.subr.mxu0 %v1200_v8  ;;  %v1360_v43 = vpop.permute.xlu1 %1359 }
 0x306   :  { %v1362_v47 = vsel %vm571_vm6, %v1360_v43, %v1358_v9  ;;  %v1361_v29 = vsel %vm571_vm6, %v1358_v9, %v1360_v43 }
 0x307   :  { %1773 = vmatmul.mubr.msk.f32.vlgmr.msra.gmra.mrb[2].mxu0 %vm160_vm3, %v1772_v40  ;;  %v1364_v20 = vmul.f32 %v2103_v59, %v1362_v47  ;;  %v1363_v37 = vmul.f32 %v2118_v2, %v1361_v29  ;;  %v1778_v2 = vld [vmem:[%s2326_s4 + $0x70] sm:$0xff] }
 0x308   :  { %1207 = vmatpush1.msra.mxu0 %v1199_v10  ;;  %v1444_v12 = vpop.permute.xlu0 %1443  ;;  %1270 = vmatprep.mubr.f32.mxu0 %v1885_v0 }
 0x309   :  { %1284 = vmatprep.subr.mxu0 %v938_v50  ;;  %v1446_v14 = vpop.permute.xlu1 %1445 }
 0x30a   :  { %v1448_v33 = vsel %vm661_vm7, %v1446_v14, %v1444_v12 }
 0x30b   :  { %v1450_v38 = vmul.f32 %v2125_v4, %v1448_v33 }
 0x30c   :  { %v1530_v15 = vpop.permute.xlu0 %1529 }
 0x30d   :  { %v1532_v19 = vpop.permute.xlu1 %1531 }
 0x30e   :  { %v1533_v44 = vsel %vm751_vm8, %v1530_v15, %v1532_v19 }
 0x30f   :  { %1775 = vmatmul.mubr.msk.f32.vlgmr.msra.gmra.mrb[2].mxu0 %vm160_vm3, %v1774_v16 }
 0x310   :  { %1285 = vmatpush1.msra.mxu0 %v937_v49  ;;  %v950_v53 = vpop.permute.xlu0 %949  ;;  %1348 = vmatprep.mubr.f32.mxu0 %v1885_v0  ;;  %v1782_v49 = vld [vmem:[%s2326_s4 + $0x80] sm:$0xff] }
 0x311   :  { %1370 = vmatprep.subr.mxu0 %v1364_v20  ;;  %v952_v22 = vpop.permute.xlu1 %951 }
 0x312   :  { %v953_v26 = vsel %vm150_vm1, %v950_v53, %v952_v22  ;;  %v954_v28 = vsel %vm150_vm1, %v952_v22, %v950_v53 }
 0x313   :  { %v955_v30 = vmul.f32 %v2024_v24, %v954_v28  ;;  %v956_v59 = vmul.f32 %v2019_v23, %v953_v26  ;;  %v1447_v23 = vsel %vm661_vm7, %v1444_v12, %v1446_v14  ;;  %v1534_v24 = vsel %vm751_vm8, %v1532_v19, %v1530_v15 }
 0x314   :  { %v1449_v4 = vmul.f32 %v2140_v11, %v1447_v23  ;;  %v1536_v39 = vmul.f32 %v2147_v13, %v1534_v24  ;;  %v1616_v41 = vpop.permute.xlu0 %1615  ;;  %v1780_v11 = vld [vmem:[%s2326_s4 + $0x78] sm:$0xff]  ;;  %v1535_v13 = vmul.f32 %v2162_v25, %v1533_v44  ;;  %v1784_v25 = vld [vmem:[%s2326_s4 + $0x88] sm:$0xff]  ;;  %s1727_s4 = sshll.u32 %s1895_s16, 4  ;;  %s1728_s4 = int_to_ptr.vmem [resolvable:$true] %s1727_s4 }
 0x315   :  { %962 = vmatprep.subr.mxu1 %v956_v59  ;;  %v1618_v42 = vpop.permute.xlu1 %1617  ;;  %s1858_s5 = scalar_lea.vmem %s1728_s4, 256  ;;  %p1863_p9 = scmp.lt.s32.totalorder %s1728_s4, %s1728_s4 }
 0x316   :  { %963 = vmatpush1.msra.mxu1 %v955_v30  ;;  %v1620_v45 = vsel %vm841_vm9, %v1618_v42, %v1616_v41  ;;  %v1619_v48 = vsel %vm841_vm9, %v1616_v41, %v1618_v42  ;;  %p1859_p8 = scmp.ne.s32.totalorder %s1728_s4, %s1858_s5  ;;  %p1864_p10 = scmp.lt.s32.totalorder %s1858_s5, %s1858_s5 }
 0x317   :  { %1777 = vmatmul.mubr.msk.f32.vlgmr.msra.gmra.mrb[2].mxu0 %vm160_vm3, %v1776_v35  ;;  %1770 = vmatmul.mubr.msk.f32.vlgmr.msra.gmra.mrb[2].mxu1 %vm160_vm3, %v1769_v36  ;;  %v1622_v46 = vmul.f32 %v2169_v27, %v1620_v45  ;;  %v1621_v50 = vmul.f32 %v2183_v34, %v1619_v48 }
 0x318   :  { %1371 = vmatpush1.msra.mxu0 %v1363_v37  ;;  %1434 = vmatprep.mubr.f32.mxu0 %v1885_v0  ;;  %p1865_p11 = por %p1864_p10, %p1863_p9 }
 0x319   :  { %1456 = vmatprep.subr.mxu0 %v1450_v38 }
 0x31a   :  { %p1866_p12 = pnand %p1865_p11, %p1859_p8 }
 0x31f   :  { %1779 = vmatmul.mubr.msk.f32.vlgmr.msra.gmra.mrb[2].mxu0 %vm160_vm3, %v1778_v2 }
 0x320   :  { %1457 = vmatpush1.msra.mxu0 %v1449_v4  ;;  %1520 = vmatprep.mubr.f32.mxu0 %v1885_v0 }
 0x321   :  { %1542 = vmatprep.subr.mxu0 %v1536_v39 }
 0x325   :  { %v1705_v55 = vpop.permute.xlu0 %1704 }
 0x327   :  { %1781 = vmatmul.mubr.msk.f32.vlgmr.msra.gmra.mrb[2].mxu0 %vm160_vm3, %v1780_v11 }
 0x328   :  { %1543 = vmatpush1.msra.mxu0 %v1535_v13  ;;  %1606 = vmatprep.mubr.f32.mxu0 %v1885_v0 }
 0x329   :  { %1628 = vmatprep.subr.mxu0 %v1622_v46 }
 0x32f   :  { %1783 = vmatmul.mubr.msk.f32.vlgmr.msra.gmra.mrb[2].mxu0 %vm160_vm3, %v1782_v49 }
 0x330   :  { %1629 = vmatpush1.msra.mxu0 %v1621_v50  ;;  %1692 = vmatprep.mubr.f32.mxu0 %v1885_v0  ;;  %v1714_v0 = vld [vmem:[#allocation2 + $0x8] sm:$0xff] }
 0x337   :  { %1785 = vmatmul.mubr.msk.f32.vlgmr.msra.gmra.mrb[2].mxu0 %vm160_vm3, %v1784_v25 }
 0x3ea   :  { %v1028_v27 = vpop.f32.mrb[2].mxu1 }
 0x3eb   :  { %v1030_v21 = vpop.f32.mrb[3].mxu1 }
 0x40a   :  { %v1694_v51 = vpop.f32.mrb[2].mxu0 }
 0x40b   :  { %v1790_v52 = vadd.f32 %v1694_v51, %v1028_v27  ;;  %v1696_v54 = vpop.f32.mrb[3].mxu0 }
 0x40c   :  { %v1791_v56 = vadd.f32 %v1696_v54, %v1030_v21 }
 0x40d   :  { %v1707_v57 = vadd.f32 %v1790_v52, %v1705_v55 }
 0x40e   :  { %v1708_v34 = vadd.f32 %v1791_v56, %v1705_v55 }
 0x40f   :  { %v1709_v58 = vmul.f32 0.01, %v1707_v57 }
 0x410   :  { %v1710_v61 = vmul.f32 0.01, %v1708_v34 }
 0x411   :  { %v1711_v62 = vmax.f32 %v1707_v57, %v1709_v58 }
 0x412   :  { %v1712_v63 = vmax.f32 %v1708_v34, %v1710_v61 }
 0x413   :  { %v1715_v1 = vadd.f32 %v1713_v60, %v1711_v62 }
 0x414   :  { %v1716_v3 = vadd.f32 %v1714_v0, %v1712_v63 }
 0x415   :  { %v1717_v31 = vadd.f32 %v1715_v1, %v1974_v17 }
 0x416   :  { %v1718_v32 = vadd.f32 %v1716_v3, %v1976_v18 }
 0x417   :  { %1719 = vst [vmem:[#allocation5] sm:$0xff] %v1717_v31 }
 0x418   :  { %1720 = vst [vmem:[#allocation5 + $0x8] sm:$0xff] %v1718_v32 }
 0x419   :  { %1869 = shalt.err (!%p1866_p12)
}
 0x41a   :  { %s1870_s19 = scalar_lea.hbm %s2330_s8, 256 }
 0x41b   :  { %p1871_p13 = scmp.ne.s32.totalorder %s2330_s8, %s1870_s19  ;;  %p1874_p0 = scmp.lt.u32.totalorder %s1870_s19, %s2330_s8 }
 0x41d   :  { %p1876_p1 = pnand %p1874_p0, %p1871_p13 }
 0x41f   :  { %1879 = shalt.err (!%p1876_p1)
}
 0x420   :  { %1730 = dma.vmem_to_hbm [thread:$0]  %s1728_s4, 256, %s2330_s8, [#allocation4]  }
 0x421   :  { %1882 = dma.done.wait [#allocation4], 256  }
 0x422   :  { %1883 = vsyncadd [#allocation4], 4294967040 }
 0x423   :  { %1734 = vsyncpa [#allocation3], 1 }
 0x424   :  { %1735 = vsyncpa [#allocation4], 1 }

</bundles_post_ra>
